<compile_context>
chip_gen: v7x
topology: tpu7x:2x2x1
jax: 0.10.0
libtpu: 0.0.40
codegen_flags: <defaults>
</compile_context>

<pallas_src>
import math

import jax
import jax.numpy as jnp
from jax.experimental import pallas as pl
from jax.experimental.pallas import tpu as pltpu


_VMEM_LIMIT_BYTES = 48 * 1024 * 1024   # conservative: fits v7x (64 MiB physical)
_VMEM_BUDGET_FRAC = 0.75               # leave headroom for compiler scratch


# ---------------------------------------------------------------------------
# Kernels
# ---------------------------------------------------------------------------
def _pe_add_kernel(x_ref, pe_ref, o_ref):
    # x_ref/o_ref: (ts, B, D);  pe_ref: (ts, D) broadcast over the batch axis.
    pe = pe_ref[...].astype(x_ref.dtype)[:, None, :]
    o_ref[...] = (x_ref[...] + pe).astype(o_ref.dtype)


def _pe_add_dropout_kernel(x_ref, pe_ref, m_ref, o_ref):
    # m_ref holds the pre-scaled dropout multiplier {0, 1/(1-p)} in x.dtype,
    # so dropout is a single multiply fused with the positional add.
    pe = pe_ref[...].astype(x_ref.dtype)[:, None, :]
    o_ref[...] = ((x_ref[...] + pe) * m_ref[...]).astype(o_ref.dtype)


# ---------------------------------------------------------------------------
# Parameter (buffer) construction -- mirrors the torch __init__ exactly
# ---------------------------------------------------------------------------
def make_pe_buffer(d_model: int, max_len: int = 5000, dtype=jnp.float32):
    position = jnp.arange(max_len, dtype=jnp.float32)[:, None]              # (L, 1)
    div_term = jnp.exp(jnp.arange(0, d_model, 2, dtype=jnp.float32)
                       * (-math.log(10000.0) / d_model))                    # (D/2,)
    angles = position * div_term                                            # (L, D/2)
    pe = jnp.zeros((max_len, d_model), dtype=jnp.float32)
    pe = pe.at[:, 0::2].set(jnp.sin(angles))
    pe = pe.at[:, 1::2].set(jnp.cos(angles))
    return pe.astype(dtype)


# ---------------------------------------------------------------------------
# Tile selection: biggest seq tile that fits the VMEM budget
# ---------------------------------------------------------------------------
def _pick_seq_tile(S: int, row_bytes: int) -> int:
    """Largest divisor of S whose double-buffered tile fits the VMEM budget.

    Prefers multiples of 8 (sublane-aligned second-to-last dim for the pe
    block); falls back to the largest fitting divisor otherwise.
    """
    budget = int(_VMEM_BUDGET_FRAC * _VMEM_LIMIT_BYTES)
    cap = max(1, budget // max(row_bytes, 1))
    best, best_aligned = 1, None
    for t in range(1, S + 1):
        if S % t == 0 and t <= cap:
            best = t
            if t % 8 == 0:
                best_aligned = t
    return best_aligned if best_aligned is not None else best


# ---------------------------------------------------------------------------
# Wrapper
# ---------------------------------------------------------------------------
def positional_encoding(x, pe, *, p: float = 0.1, deterministic: bool = True,
                        rng_key=None, seq_tile: int | None = None,
                        donate_x: bool = False):
    """x: (S, B, D);  pe: (max_len, D) with max_len >= S."""
    S, B, D = x.shape
    assert pe.shape[0] >= S and pe.shape[1] == D

    x_item = jnp.dtype(x.dtype).itemsize
    pe_item = jnp.dtype(pe.dtype).itemsize
    n_xlike = 2 if deterministic else 3          # x in + out (+ dropout mask)
    # double-buffered bytes per seq row held live in VMEM
    row_bytes = 2 * (n_xlike * B * D * x_item + D * pe_item)
    ts = _pick_seq_tile(S, row_bytes) if seq_tile is None else seq_tile
    assert S % ts == 0, "seq_len must be divisible by the seq tile"
    grid = (S // ts,)

    out_shape = jax.ShapeDtypeStruct(x.shape, x.dtype)
    cparams = pltpu.CompilerParams(
        dimension_semantics=("parallel",),       # independent seq tiles; v7x 2 TCs
        vmem_limit_bytes=_VMEM_LIMIT_BYTES,
    )
    x_spec = pl.BlockSpec((ts, B, D), lambda i: (i, 0, 0))
    pe_spec = pl.BlockSpec((ts, D), lambda i: (i, 0))   # slices pe[:S] tile-wise
    # donate_x: only set when the caller donates x (in-place update); avoids an
    # extra HBM allocation but does not reduce bytes moved.
    io_alias = {0: 0} if donate_x else {}

    if deterministic:  # eval mode: dropout is identity
        return pl.pallas_call(
            _pe_add_kernel,
            out_shape=out_shape,
            grid=grid,
            in_specs=[x_spec, pe_spec],
            out_specs=x_spec,
            compiler_params=cparams,
            input_output_aliases=io_alias,
        )(x, pe)

    # training mode: dropout via a precomputed, pre-scaled multiplier mask.
    if rng_key is None:
        rng_key = jax.random.PRNGKey(0)
    keep = jax.random.bernoulli(rng_key, 1.0 - p, x.shape)
    scale = jnp.asarray(1.0 / (1.0 - p), dtype=x.dtype)
    mask = keep.astype(x.dtype) * scale          # {0, 1/(1-p)} in x.dtype

    return pl.pallas_call(
        _pe_add_dropout_kernel,
        out_shape=out_shape,
        grid=grid,
        in_specs=[x_spec, pe_spec, x_spec],
        out_specs=x_spec,
        compiler_params=cparams,
        input_output_aliases=io_alias,
    )(x, pe, mask)


# ---------------------------------------------------------------------------
# Demo / self-check
# ---------------------------------------------------------------------------
if __name__ == "__main__":
    key = jax.random.PRNGKey(0)

    d_model = 32
    seq_len, batch = 8, 2
    max_len = 5000

    x = jax.random.normal(key, (seq_len, batch, d_model), dtype=jnp.float32)
    pe = make_pe_buffer(d_model, max_len=max_len, dtype=x.dtype)
    ref = x + pe[:seq_len][:, None, :]

    # eval mode (dropout == identity): exact check against the reference.
    y = jax.block_until_ready(positional_encoding(x, pe, deterministic=True))
    assert jnp.allclose(y, ref, atol=1e-6, rtol=1e-6), "eval-mode mismatch"

    # train mode: every output element is either 0 (dropped) or (x+pe)/(1-p).
    p = 0.1
    y_drop = jax.block_until_ready(
        positional_encoding(x, pe, p=p, deterministic=False,
                            rng_key=jax.random.PRNGKey(123)))
    assert y_drop.shape == x.shape
    scale = 1.0 / (1.0 - p)
    ok = jnp.all(jnp.isclose(y_drop, 0.0, atol=1e-6)
                 | jnp.isclose(y_drop, ref * scale, rtol=1e-5, atol=1e-5))
    assert bool(ok), "train-mode dropout values inconsistent"

    print("KERNEL_OK")
</pallas_src>

<mosaic_0001>
module attributes {stable_mosaic.version = 11 : i64} {
  func.func @_pe_add_kernel(%arg0: i32, %arg1: memref<8x2x32xf32, #tpu.memory_space<vmem>>, %arg2: memref<8x32xf32, #tpu.memory_space<vmem>>, %arg3: memref<8x2x32xf32, #tpu.memory_space<vmem>>) attributes {dimension_semantics = [#tpu.dimension_semantics<parallel>], iteration_bounds = array<i64: 1>, scalar_prefetch = 0 : i64, scratch_operands = 0 : i64, tpu.core_type = #tpu.core_type<tc>, window_params = [{transform_indices = @transform_0, window_bounds = array<i64: 8, 2, 32>}, {transform_indices = @transform_1, window_bounds = array<i64: 8, 32>}, {transform_indices = @transform_2, window_bounds = array<i64: 8, 2, 32>}]} {
    %c0 = arith.constant 0 : index
    %c0_0 = arith.constant 0 : index
    %0 = vector.load %arg2[%c0, %c0_0] : memref<8x32xf32, #tpu.memory_space<vmem>>, vector<8x32xf32>
    %1 = vector.shape_cast %0 : vector<8x32xf32> to vector<8x1x32xf32>
    %c0_1 = arith.constant 0 : index
    %c0_2 = arith.constant 0 : index
    %c0_3 = arith.constant 0 : index
    %2 = vector.load %arg1[%c0_1, %c0_2, %c0_3] : memref<8x2x32xf32, #tpu.memory_space<vmem>>, vector<8x2x32xf32>
    %3 = vector.broadcast %1 : vector<8x1x32xf32> to vector<8x2x32xf32>
    %4 = arith.addf %2, %3 : vector<8x2x32xf32>
    %c0_4 = arith.constant 0 : index
    %c0_5 = arith.constant 0 : index
    %c0_6 = arith.constant 0 : index
    %5 = vector.load %arg3[%c0_4, %c0_5, %c0_6] : memref<8x2x32xf32, #tpu.memory_space<vmem>>, vector<8x2x32xf32>
    tpu.vector_store %arg3[%c0_4, %c0_5, %c0_6], %4 {strides = array<i32>} : memref<8x2x32xf32, #tpu.memory_space<vmem>>, vector<8x2x32xf32>,
    return
  }
  func.func @transform_0(%arg0: i32) -> (i32, i32, i32) {
    %c0_i32 = arith.constant 0 : i32
    %c0_i32_0 = arith.constant 0 : i32
    %c0_i32_1 = arith.constant 0 : i32
    return %arg0, %c0_i32, %c0_i32_0 : i32, i32, i32
  }
  func.func @transform_1(%arg0: i32) -> (i32, i32) {
    %c0_i32 = arith.constant 0 : i32
    %c0_i32_0 = arith.constant 0 : i32
    return %arg0, %c0_i32 : i32, i32
  }
  func.func @transform_2(%arg0: i32) -> (i32, i32, i32) {
    %c0_i32 = arith.constant 0 : i32
    %c0_i32_0 = arith.constant 0 : i32
    %c0_i32_1 = arith.constant 0 : i32
    return %arg0, %c0_i32, %c0_i32_0 : i32, i32, i32
  }
}

</mosaic_0001>

<bundles_post_ra>
// kernel: tpu_custom_call.1
= control target key start
LH: loop header
LB: loop body
LE: loop exit
PB: predicated region body
PF: predicated region fallthrough
CT: control target
= control target key end

     0   :  { %v18_v1 = vlaneseq  ;;  %v172_v2 = vmov 1966171168   ;;  %s238_s0 = inlined_call_operand.vmem [shape: f32[8,2,32], index: 0, kind: input, shape index: {}]   ;;  %s239_s1 = inlined_call_operand.vmem [shape: f32[5000,32], index: 1, kind: input, shape index: {}]   ;;  %s240_s2 = inlined_call_operand.hbm [shape: f32[8,2,32], index: 2, kind: output, shape index: {}]  }
   0x1   :  { %v12_v0 = vld [vmem:[%s239_s1] sm:$0xff]  ;;  %v16_v3 = vunpack.c.l.s4 %v172_v2 }
   0x2   :  { %v19_v4 = vshrl.u32 %v18_v1, 7  ;;  %v14_v6 = vcombine.high %v12_v0, %v12_v0 }
   0x3   :  { %v17_v5 = vunpack.c.0.s8 %v16_v3 }
   0x4   :  { %7 = vsyncpa [#allocation3], 0  ;;  %v73_v9 = vsub.s32 0, %v19_v4  ;;  %v63_v15 = vld [vmem:[%s238_s0] sm:$0x3]  ;;  %vm119_vm0 = vcmask 254976  }
   0x5   :  { %v20_v7 = vsub.s32 %v17_v5, %v19_v4  ;;  %v67_v19 = vld [vmem:[%s238_s0 + $0x8] sm:$0x3]  ;;  %v64_v21 = vld [vmem:[%s238_s0 + $0x2] sm:$0x3]  ;;  %v65_v22 = vld [vmem:[%s238_s0 + $0x4] sm:$0x3] }
   0x6   :  { %v68_v29 = vld [vmem:[%s238_s0 + $0xa] sm:$0x3]  ;;  %v69_v30 = vld [vmem:[%s238_s0 + $0xc] sm:$0x3]  ;;  %v66_v31 = vld [vmem:[%s238_s0 + $0x6] sm:$0x3] }
   0x7   :  { %v21_v8 = vrot.slane %v12_v0, %v20_v7  ;;  %v28_v10 = vrot.slane %v14_v6, %v20_v7  ;;  %v70_v39 = vld [vmem:[%s238_s0 + $0xe] sm:$0x3]  ;;  %s173_s26 = smov [#allocation2]  }
   0x8   :  { %s133_s27 = sshll.u32 %s173_s26, 4  ;;  %s134_s27 = int_to_ptr.vmem [resolvable:$true] %s133_s27 }
   0x9   :  { %v37_v11 = vrot.slane %v21_v8, %v20_v7  ;;  %v29_v12 = vcombine.high %v21_v8, %v21_v8  ;;  %v44_v13 = vrot.slane %v28_v10, %v20_v7  ;;  %v30_v14 = vcombine.high %v28_v10, %v28_v10  ;;  %s148_s0 = scalar_lea.vmem %s134_s27, 256  ;;  %p153_p1 = scmp.lt.s32.totalorder %s134_s27, %s134_s27 }
   0xa   :  { %p149_p0 = scmp.ne.s32.totalorder %s134_s27, %s148_s0  ;;  %p154_p2 = scmp.lt.s32.totalorder %s148_s0, %s148_s0 }
   0xb   :  { %v74_v16 = vrot.slane %v37_v11, %v73_v9  ;;  %v51_v17 = vrot.slane %v29_v12, %v20_v7  ;;  %v59_v18 = vcombine.high %v37_v11, %v37_v11  ;;  %v90_v20 = vrot.slane %v44_v13, %v73_v9 }
   0xc   :  { %v58_v23 = vrot.slane %v30_v14, %v20_v7  ;;  %v60_v24 = vcombine.high %v44_v13, %v44_v13  ;;  %p155_p3 = por %p154_p2, %p153_p1 }
   0xd   :  { %v111_v25 = vadd.f32 %v74_v16, %v63_v15  ;;  %v78_v26 = vrot.slane %v51_v17, %v73_v9  ;;  %v82_v27 = vrot.slane %v59_v18, %v73_v9  ;;  %v61_v28 = vcombine.high %v51_v17, %v51_v17 }
   0xe   :  { %v115_v32 = vadd.f32 %v90_v20, %v67_v19  ;;  %v94_v33 = vrot.slane %v58_v23, %v73_v9  ;;  %v98_v34 = vrot.slane %v60_v24, %v73_v9  ;;  %v62_v35 = vcombine.high %v58_v23, %v58_v23  ;;  %p156_p4 = pnand %p155_p3, %p149_p0 }
   0xf   :  { %120 = vst.msk [vmem:[#allocation2] sm:$0x3] %vm119_vm0, %v111_v25  ;;  %v112_v36 = vadd.f32 %v78_v26, %v64_v21  ;;  %v113_v37 = vadd.f32 %v82_v27, %v65_v22  ;;  %v86_v38 = vrot.slane %v61_v28, %v73_v9 }
  0x10   :  { %124 = vst.msk [vmem:[#allocation2 + $0x8] sm:$0x3] %vm119_vm0, %v115_v32  ;;  %v116_v40 = vadd.f32 %v94_v33, %v68_v29  ;;  %v117_v41 = vadd.f32 %v98_v34, %v69_v30  ;;  %v102_v42 = vrot.slane %v62_v35, %v73_v9 }
  0x11   :  { %121 = vst.msk [vmem:[#allocation2 + $0x2] sm:$0x3] %vm119_vm0, %v112_v36  ;;  %122 = vst.msk [vmem:[#allocation2 + $0x4] sm:$0x3] %vm119_vm0, %v113_v37  ;;  %v114_v43 = vadd.f32 %v86_v38, %v66_v31 }
  0x12   :  { %125 = vst.msk [vmem:[#allocation2 + $0xa] sm:$0x3] %vm119_vm0, %v116_v40  ;;  %126 = vst.msk [vmem:[#allocation2 + $0xc] sm:$0x3] %vm119_vm0, %v117_v41  ;;  %v118_v44 = vadd.f32 %v102_v42, %v70_v39 }
  0x13   :  { %123 = vst.msk [vmem:[#allocation2 + $0x6] sm:$0x3] %vm119_vm0, %v114_v43 }
  0x14   :  { %127 = vst.msk [vmem:[#allocation2 + $0xe] sm:$0x3] %vm119_vm0, %v118_v44 }
  0x15   :  { %159 = shalt.err (!%p156_p4)
}
  0x16   :  { %s160_s30 = scalar_lea.hbm %s240_s2, 256 }
  0x17   :  { %p161_p5 = scmp.ne.s32.totalorder %s240_s2, %s160_s30  ;;  %p164_p6 = scmp.lt.u32.totalorder %s160_s30, %s240_s2 }
  0x19   :  { %p166_p7 = pnand %p164_p6, %p161_p5 }
  0x1b   :  { %169 = shalt.err (!%p166_p7)
}
  0x1c   :  { %s174_s7 = smov 32   ;;  %s175_s8 = smov 2  }
  0x1d   :  { %139 = dma.vmem_to_hbm [thread:$0]  %s134_s27, 256, %s240_s2, [#allocation3], %s174_s7, %s174_s7, %s175_s8  }
  0x1e   :  { %170 = dma.done.wait [#allocation3], 256  }
  0x1f   :  { %171 = vsyncadd [#allocation3], 4294967040 }
  0x20   :  { %143 = vsyncpa [#allocation3], 1 }

</bundles_post_ra>
